<compile_context>
chip_gen: v7x
topology: tpu7x:2x2x1
jax: 0.10.0
libtpu: 0.0.40
codegen_flags: <defaults>
</compile_context>

<pallas_src>
import math

import jax
import jax.numpy as jnp
from jax import lax
from jax.experimental import pallas as pl
from jax.experimental.pallas import tpu as pltpu

_EPS = 1e-12               # torch.nn.functional.normalize default eps
_EPS2 = _EPS * _EPS        # clamp sum-of-squares at eps^2  ==  clamp norm at eps
_MIB = 1024 * 1024


def _round_up(x: int, m: int) -> int:
    return -(-x // m) * m


def _sublane_pack(dtype) -> int:
    # Rows per sublane group: f32 -> 8, bf16 -> 16, int8/fp8 -> 32.
    return max(8, 32 // jnp.dtype(dtype).itemsize)


def _vmem_capacity_bytes() -> int:
    try:
        return int(pltpu.get_tpu_info().vmem_capacity_bytes)
    except Exception:
        return 64 * _MIB   # conservative fallback (v7x per-TensorCore)


def _target_tile_bytes(vmem_cap: int) -> int:
    # v5e/v6e (128 MiB physical VMEM): ~4 MiB per padded tile buffer amortizes
    # per-grid-step overhead further; v7x (64 MiB/TC): ~1.5 MiB so the
    # double-buffered in/out tiles + f32 intermediates stay well inside the
    # 32 MiB scoped default.
    return 4 * _MIB if vmem_cap >= 96 * _MIB else (3 * _MIB) // 2


# ---------------------------------------------------------------- kernels


def _l2norm_mid_kernel(x_ref, o_ref):
    # x_ref / o_ref: (tile_pre, C, tile_post) block; normalize over axis 1.
    C = x_ref.shape[1]
    pack = _sublane_pack(x_ref.dtype)
    x = x_ref[...]                                    # native dtype (bf16 stays bf16)
    if C < pack:
        # Small C: per-channel accumulation over dense 2-D slabs -> pure VPU
        # adds; avoids the cross-sublane (XLU) reduce over a half-empty vreg
        # and a full padded 3-D f32 copy of the tile.
        ss = jnp.zeros((x.shape[0], x.shape[2]), jnp.float32)
        for c in range(C):
            xc = x[:, c, :].astype(jnp.float32)
            ss = ss + xc * xc
        inv = lax.rsqrt(jnp.maximum(ss, _EPS2))[:, None, :]
    else:
        xf = x.astype(jnp.float32)
        ss = jnp.sum(xf * xf, axis=1, keepdims=True)  # (tile_pre, 1, tile_post)
        inv = lax.rsqrt(jnp.maximum(ss, _EPS2))
    # rsqrt of the eps^2-clamped sum of squares == x / clamp_min(||x||_2, eps);
    # the final multiply runs in the input dtype (no second f32 store-path copy).
    o_ref[...] = (x * inv.astype(x.dtype)).astype(o_ref.dtype)


def _l2norm_last_kernel(x_ref, o_ref):
    # x_ref / o_ref: (tile_rows, D) block; normalize over the last (lane) axis.
    x = x_ref[...]
    xf = x.astype(jnp.float32)
    ss = jnp.sum(xf * xf, axis=-1, keepdims=True)     # (tile_rows, 1)
    inv = lax.rsqrt(jnp.maximum(ss, _EPS2))
    o_ref[...] = (x * inv.astype(x.dtype)).astype(o_ref.dtype)


# ---------------------------------------------------------------- wrappers


def _normalize_mid(x3):
    """L2-normalize a (pre, C, post) array over its middle axis."""
    pre, C, post = x3.shape
    dtype = x3.dtype
    itemsize = jnp.dtype(dtype).itemsize
    pack = _sublane_pack(dtype)
    padded_C = _round_up(C, pack)                 # sublane padding of the minor tile

    vmem_cap = _vmem_capacity_bytes()
    target = _target_tile_bytes(vmem_cap)

    # Lane tile: multiples of 128 when possible (lane-dense, unmasked stores).
    if post >= 128:
        cap = max(128, (target // max(padded_C * itemsize, 1)) // 128 * 128)
        tile_post = min((post // 128) * 128, cap)
        padded_post = tile_post
    else:
        # post < 128: stores are masked at post/128 lane utilization and cannot
        # reach roofline; amortize by maximizing tile_pre against the padded
        # budget below.  (Pad `post` to 128 upstream if the layout is yours.)
        tile_post = post
        padded_post = 128

    # Row tile: fill the per-tile budget, sized against the *padded* footprint.
    tile_pre = max(1, min(pre, target // max(padded_C * padded_post * itemsize, 1)))

    # Megacore (v7x): keep >= 2 grid steps whenever the data can be split.
    if pl.cdiv(pre, tile_pre) * pl.cdiv(post, tile_post) == 1:
        if pre >= 2:
            tile_pre = pl.cdiv(pre, 2)
        elif tile_post >= 256:
            tile_post = max(128, (tile_post // 2) // 128 * 128)
            padded_post = tile_post

    # Scoped-VMEM budget: 2 in + 2 out double-buffered padded tiles plus f32
    # intermediates + headroom, clamped to half the chip's VMEM so surrounding
    # XLA fusions keep room (matters on v7x's 64 MiB/TC).
    tile_bytes = tile_pre * padded_C * padded_post * itemsize
    f32_bytes = tile_pre * padded_post * 4                    # ss / inv slab
    if C >= pack:
        f32_bytes += tile_pre * padded_C * padded_post * 4    # full f32 copy path
    need = 4 * tile_bytes + f32_bytes + 4 * _MIB
    vmem_limit = int(min(max(need, 16 * _MIB), max(vmem_cap // 2, 16 * _MIB)))

    # Ragged trailing blocks are handled by Pallas (masked edge stores); the
    # reduction axis (C) is always a full, in-bounds block.
    grid = (pl.cdiv(pre, tile_pre), pl.cdiv(post, tile_post))

    # TODO(synk): extremely large C (padded_C * 128 * itemsize >> VMEM budget)
    # would need a reduction grid axis + VMEM accumulator; channel dims for this
    # module are small, so a full-C block is kept.
    return pl.pallas_call(
        _l2norm_mid_kernel,
        out_shape=jax.ShapeDtypeStruct((pre, C, post), dtype),
        grid_spec=pltpu.PrefetchScalarGridSpec(
            num_scalar_prefetch=0,
            grid=grid,
            in_specs=[pl.BlockSpec((tile_pre, C, tile_post), lambda i, j: (i, 0, j))],
            out_specs=pl.BlockSpec((tile_pre, C, tile_post), lambda i, j: (i, 0, j)),
        ),
        compiler_params=pltpu.CompilerParams(
            dimension_semantics=("parallel", "parallel"),
            vmem_limit_bytes=vmem_limit),
    )(x3)


def _normalize_last(x2):
    """L2-normalize a (rows, D) array over its last axis."""
    rows, D = x2.shape
    dtype = x2.dtype
    itemsize = jnp.dtype(dtype).itemsize
    pack = _sublane_pack(dtype)
    padded_D = _round_up(D, 128)

    vmem_cap = _vmem_capacity_bytes()
    target = _target_tile_bytes(vmem_cap)

    if rows >= pack:
        cap = max(pack, (target // max(padded_D * itemsize, 1)) // pack * pack)
        tile_rows = min((rows // pack) * pack, cap)
    else:
        tile_rows = rows                      # full extent (< one sublane pack)

    # Megacore (v7x): if everything fits in a single tile but there are at
    # least two sublane packs of rows, split so both TensorCores get work.
    if pl.cdiv(rows, tile_rows) == 1 and rows >= 2 * pack:
        tile_rows = _round_up(pl.cdiv(rows, 2), pack)

    padded_rows = _round_up(tile_rows, pack)
    tile_bytes = padded_rows * padded_D * itemsize
    f32_bytes = padded_rows * padded_D * 4 + padded_rows * 128 * 4
    need = 4 * tile_bytes + f32_bytes + 4 * _MIB
    vmem_limit = int(min(max(need, 16 * _MIB), max(vmem_cap // 2, 16 * _MIB)))

    # TODO(synk): a very large trailing dim D (padded_rows * padded_D beyond the
    # VMEM budget) would need reduction-axis tiling; not required for this module.
    grid = (pl.cdiv(rows, tile_rows),)
    return pl.pallas_call(
        _l2norm_last_kernel,
        out_shape=jax.ShapeDtypeStruct((rows, D), dtype),
        grid_spec=pltpu.PrefetchScalarGridSpec(
            num_scalar_prefetch=0,
            grid=grid,
            in_specs=[pl.BlockSpec((tile_rows, D), lambda i: (i, 0))],
            out_specs=pl.BlockSpec((tile_rows, D), lambda i: (i, 0)),
        ),
        compiler_params=pltpu.CompilerParams(
            dimension_semantics=("parallel",),
            vmem_limit_bytes=vmem_limit),
    )(x2)


def normalize(x, dim: int):
    """Equivalent of torch.nn.functional.normalize(x, dim=dim, p=2)."""
    dim = dim % x.ndim
    shape = x.shape
    C = shape[dim]
    pre = math.prod(shape[:dim])
    post = math.prod(shape[dim + 1:])

    if post == 1:
        # Normalization axis is (effectively) the trailing axis.
        out = _normalize_last(x.reshape(pre, C))
    else:
        # Keep the original memory layout: (pre, C, post) is a free reshape.
        out = _normalize_mid(x.reshape(pre, C, post))
    return out.reshape(shape)


if __name__ == "__main__":
    key0, key1 = jax.random.split(jax.random.PRNGKey(0), 2)

    # NCHW input; Normalize(dim=1) normalizes over the channel axis.
    x = jax.random.normal(key0, (2, 4, 16, 16), dtype=jnp.float32)
    y = jax.block_until_ready(normalize(x, dim=1))

    norm = jnp.sqrt(jnp.sum(x * x, axis=1, keepdims=True))
    y_ref = x / jnp.maximum(norm, _EPS)
    assert jnp.allclose(y, y_ref, atol=1e-5, rtol=1e-4), "mismatch vs reference (dim=1)"

    # Also exercise the trailing-axis path.
    x2 = jax.random.normal(key1, (8, 32), dtype=jnp.float32)
    y2 = jax.block_until_ready(normalize(x2, dim=-1))
    norm2 = jnp.sqrt(jnp.sum(x2 * x2, axis=-1, keepdims=True))
    y2_ref = x2 / jnp.maximum(norm2, _EPS)
    assert jnp.allclose(y2, y2_ref, atol=1e-5, rtol=1e-4), "mismatch vs reference (dim=-1)"

    print("KERNEL_OK")
</pallas_src>

<mosaic_0001>
module attributes {stable_mosaic.version = 11 : i64} {
  func.func @_l2norm_mid_kernel(%arg0: i32, %arg1: i32, %arg2: memref<1x4x256xf32, #tpu.memory_space<vmem>>, %arg3: memref<1x4x256xf32, #tpu.memory_space<vmem>>) attributes {dimension_semantics = [#tpu.dimension_semantics<parallel>, #tpu.dimension_semantics<parallel>], iteration_bounds = array<i64: 2, 1>, scalar_prefetch = 0 : i64, scratch_operands = 0 : i64, tpu.core_type = #tpu.core_type<tc>, window_params = [{transform_indices = @transform_0, window_bounds = array<i64: 1, 4, 256>}, {transform_indices = @transform_1, window_bounds = array<i64: 1, 4, 256>}]} {
    %c0 = arith.constant 0 : index
    %c0_0 = arith.constant 0 : index
    %c0_1 = arith.constant 0 : index
    %0 = vector.load %arg2[%c0, %c0_0, %c0_1] : memref<1x4x256xf32, #tpu.memory_space<vmem>>, vector<1x4x256xf32>
    %cst = arith.constant 0.000000e+00 : f32
    %1 = vector.broadcast %cst : f32 to vector<1x256xf32>
    %2 = vector.extract_strided_slice %0 {offsets = [0, 0, 0], sizes = [1, 1, 256], strides = [1, 1, 1]} : vector<1x4x256xf32> to vector<1x1x256xf32>
    %3 = vector.shape_cast %2 : vector<1x1x256xf32> to vector<1x256xf32>
    %4 = arith.mulf %3, %3 : vector<1x256xf32>
    %5 = arith.addf %1, %4 : vector<1x256xf32>
    %6 = vector.extract_strided_slice %0 {offsets = [0, 1, 0], sizes = [1, 1, 256], strides = [1, 1, 1]} : vector<1x4x256xf32> to vector<1x1x256xf32>
    %7 = vector.shape_cast %6 : vector<1x1x256xf32> to vector<1x256xf32>
    %8 = arith.mulf %7, %7 : vector<1x256xf32>
    %9 = arith.addf %5, %8 : vector<1x256xf32>
    %10 = vector.extract_strided_slice %0 {offsets = [0, 2, 0], sizes = [1, 1, 256], strides = [1, 1, 1]} : vector<1x4x256xf32> to vector<1x1x256xf32>
    %11 = vector.shape_cast %10 : vector<1x1x256xf32> to vector<1x256xf32>
    %12 = arith.mulf %11, %11 : vector<1x256xf32>
    %13 = arith.addf %9, %12 : vector<1x256xf32>
    %14 = vector.extract_strided_slice %0 {offsets = [0, 3, 0], sizes = [1, 1, 256], strides = [1, 1, 1]} : vector<1x4x256xf32> to vector<1x1x256xf32>
    %15 = vector.shape_cast %14 : vector<1x1x256xf32> to vector<1x256xf32>
    %16 = arith.mulf %15, %15 : vector<1x256xf32>
    %17 = arith.addf %13, %16 : vector<1x256xf32>
    %cst_2 = arith.constant 1.000000e-24 : f32
    %18 = vector.broadcast %cst_2 : f32 to vector<1x256xf32>
    %19 = arith.maximumf %17, %18 : vector<1x256xf32>
    %20 = math.rsqrt %19 : vector<1x256xf32>
    %21 = vector.shape_cast %20 : vector<1x256xf32> to vector<1x1x256xf32>
    %22 = vector.broadcast %21 : vector<1x1x256xf32> to vector<1x4x256xf32>
    %23 = arith.mulf %0, %22 : vector<1x4x256xf32>
    %c0_3 = arith.constant 0 : index
    %c0_4 = arith.constant 0 : index
    %c0_5 = arith.constant 0 : index
    %24 = vector.load %arg3[%c0_3, %c0_4, %c0_5] : memref<1x4x256xf32, #tpu.memory_space<vmem>>, vector<1x4x256xf32>
    tpu.vector_store %arg3[%c0_3, %c0_4, %c0_5], %23 {strides = array<i32>} : memref<1x4x256xf32, #tpu.memory_space<vmem>>, vector<1x4x256xf32>,
    return
  }
  func.func @transform_0(%arg0: i32, %arg1: i32) -> (i32, i32, i32) {
    %c0_i32 = arith.constant 0 : i32
    %c0_i32_0 = arith.constant 0 : i32
    return %arg0, %c0_i32, %arg1 : i32, i32, i32
  }
  func.func @transform_1(%arg0: i32, %arg1: i32) -> (i32, i32, i32) {
    %c0_i32 = arith.constant 0 : i32
    %c0_i32_0 = arith.constant 0 : i32
    return %arg0, %c0_i32, %arg1 : i32, i32, i32
  }
}

</mosaic_0001>

<bundles_post_ra>
// kernel: tpu_custom_call.1
= control target key start
LH: loop header
LB: loop body
LE: loop exit
PB: predicated region body
PF: predicated region fallthrough
CT: control target
= control target key end

     0   :  { %6 = vsyncpa [#allocation3], 0  ;;  %s679_s0 = inlined_call_operand.hbm [shape: f32[2,4,256], index: 0, kind: input, shape index: {}]   ;;  %s680_s1 = inlined_call_operand.hbm [shape: f32[2,4,256], index: 1, kind: output, shape index: {}]  }
   0x1   :  { %8 = vsyncpa [#allocation3 + $0x1], 0 }
   0x2   :  { %9 = vsyncpa [#allocation4], 0 }
   0x3   :  { %11 = vsyncpa [#allocation4 + $0x1], 0  ;;  %s507_s6 = smov 0   ;;  %s509_s7 = smov 0  }
   0x4   :  { %s511_s8 = smov 0   ;;  %s513_s9 = smov 0  }
   0x5   :  { %s515_s10 = smov 0   ;;  %s517_s11 = smov 0  }
   0x6 LB: > { %s297_s12 = sadd.s32 4294967295, %s493_s11   ;;  %s298_s13 = sadd.s32 4294967294, %s493_s11   ;;  %s493_s11 = sphi %s517_s11, %s17_s11   ;;  %s489_s10 = sphi %s515_s10, %s696_s10   ;;  %s485_s9 = sphi %s513_s9, %s695_s9   ;;  %s481_s8 = sphi %s511_s8, %s694_s8   ;;  %s477_s7 = sphi %s509_s7, %s693_s7   ;;  %s473_s6 = sphi %s507_s6, %s692_s6  }
   0x7   : > { %s29_s14 = sadd.s32 1, %s489_s10  ;;  %s38_s15 = sadd.s32 1, %s481_s8 }
   0x8   : > { %p31_p0 = scmp.ge.s32.totalorder %s29_s14, 2  ;;  %p45_p1 = scmp.ne.s32.totalorder %s481_s8, %s477_s7 }
   0x9   : > { %p46_p2 = scmp.eq.s32.totalorder %s493_s11, 0  ;;  %p51_p3 = scmp.ne.s32.totalorder %s477_s7, %s473_s6 }
   0xa   : > { %s698_s14 = smov (%p31_p0, %s29_s14), 0  ;;  %p52_p5 = scmp.eq.s32.totalorder %s297_s12, 0 }
   0xb   : > { %p548_p4 = por %p46_p2, %p45_p1  ;;  %s33_s17 = ssub.s32 %s489_s10, %s698_s14 }
   0xc   : > { %p77_p6 = scmp.eq.s32.totalorder %s297_s12, 1  ;;  %p36_p7 = scmp.eq.s32.totalorder %s33_s17, 0 }
   0xd   : > { %p554_p8 = por %p52_p5, %p51_p3  ;;  %p83_p10 = scmp.eq.s32.totalorder %s298_s13, 1 }
   0xe   : > { %p558_p9 = por %p77_p6, %p45_p1  ;;  %p329_p13 = scmp.lt.s32.totalorder %s493_s11, 2 }
   0xf   : > { %s563_s20 = scalar_select %p36_p7, %s481_s8, %s38_s15  }
  0x10   : > { %s684_s19 = scalar_select %p558_p9, 1, 0 }
  0x11   : > { %p565_p11 = por %p83_p10, %p51_p3  ;;  %s103_s22 = sand.u32 1, %s481_s8  }
  0x12   : > { %s301_s23 = sshll.u32 %s103_s22, 3  ;;  %s315_s24 = sshll.u32 %s489_s10, 7 }
  0x13   : > { %s685_s21 = scalar_select %p565_p11, 1, 0 }
  0x14   : > { %s576_s27 = scalar_lea.hbm %s679_s0, %s315_s24  ;;  %s107_s28 = scalar_lea.vmem [#allocation2], %s301_s23 }
  0x15   : > { %s117_s29 = sshll.u32 %s107_s28, 4  ;;  %p582_p0 = pnand %p329_p13, %p548_p4  ;;  %s578_s29 = int_to_ptr.vmem [resolvable:$true] %s117_s29 }
  0x16   : > { %s104_s2 = scalar_lea.sflag [#allocation3], %s103_s22  ;;  %s381_s3 = scalar_lea.hbm %s576_s27, 128 }
  0x17   : > { %p382_p3 = scmp.ne.s32.totalorder %s576_s27, %s381_s3  ;;  %p383_p5 = pneg %p582_p0 }
  0x18   : > { %s386_s12 = scalar_lea.hbm %s679_s0, 256  ;;  %p387_p4 = scmp.lt.u32.totalorder %s576_s27, %s679_s0 }
  0x19   : > { %p384_p6 = pnand %p383_p5, %p382_p3  ;;  %p388_p10 = scmp.lt.u32.totalorder %s386_s12, %s381_s3 }
  0x1a   : > { %p390_p12 = scmp.lt.u32.totalorder %s381_s3, %s576_s27 }
  0x1b   : > { %p385_p7 = pneg %p384_p6  ;;  %p389_p13 = por %p388_p10, %p387_p4 }
  0x1d   : > { %p391_p1 = por %p390_p12, %p389_p13 }
  0x1f   : > { %p392_p2 = pnand %p391_p1, %p385_p7 }
  0x21   : > { %395 = shalt.err (!%p392_p2)
}
  0x22   : > { %s396_s16 = scalar_lea.vmem %s578_s29, 128  ;;  %s495_s17 = smov [#allocation2]  }
  0x23   : > { %p397_p3 = scmp.ne.s32.totalorder %s578_s29, %s396_s16  ;;  %s401_s22 = sshll.u32 %s495_s17, 4  ;;  %s402_s22 = int_to_ptr.vmem [resolvable:$false] %s401_s22 }
  0x24   : > { %s403_s23 = scalar_lea.vmem %s402_s22, 256  ;;  %p404_p9 = scmp.lt.s32.totalorder %s578_s29, %s402_s22 }
  0x25   : > { %p399_p6 = pnand %p397_p3, %p383_p5  ;;  %p405_p4 = scmp.lt.s32.totalorder %s403_s23, %s396_s16 }
  0x27   : > { %p400_p11 = pneg %p399_p6  ;;  %p406_p10 = por %p405_p4, %p404_p9 }
  0x29   : > { %p407_p12 = pnand %p406_p10, %p400_p11 }
  0x2b   : > { %410 = shalt.err (!%p407_p12)
}
  0x2c   : > { %324 = dma.hbm_to_vmem [thread:$0]  (!%p582_p0), %s576_s27, 128, %s578_s29, %s104_s2  }
  0x2d   : > { %p687_p1 = scmp.lt.s32.totalorder %s493_s11, 3  ;;  %p688_p2 = scmp.ge.s32.totalorder %s493_s11, 1 }
  0x2f   : > { %p123_p5 = pnand %p688_p2, %p687_p1 }
  0x30   : > { %s618_s24 = sand.u32 (!%p123_p5), 1, %s477_s7  }
  0x31   : > { %126 = sbr.rel (%p123_p5) target bundleno = 103 (0x67), region = 24  ;;  %s305_s25 = sshll.u32 (!%p123_p5), %s618_s24, 3 }
  0x32   : > { %s129_s26 = scalar_lea.sflag (!%p123_p5), [#allocation3], %s618_s24  ;;  %s132_s28 = scalar_lea.vmem (!%p123_p5), [#allocation2], %s305_s25 }
  0x38   : > { %464 = dma.done.wait (%p554_p8), %s129_s26, 128  }
  0x39   : > { %466 = vsyncadd (%p554_p8), %s129_s26, 4294967168  ;;  %v153_v0 = vld [vmem:[%s132_s28] sm:$0xff]  ;;  %v172_v9 = vlaneseq  ;;  %s150_s18 = scalar_lea.vmem [#allocation5], %s305_s25  ;;  %s316_s29 = sshll.u32 %s485_s9, 7 }
  0x3a   : > { %v154_v1 = vmul.f32 %v153_v0, %v153_v0  ;;  %s213_s27 = sshll.u32 %s150_s18, 4  ;;  %s632_s3 = scalar_lea.hbm %s680_s1, %s316_s29  ;;  %s627_s27 = int_to_ptr.vmem [resolvable:$true] %s213_s27 }
  0x3b   : > { %v173_v10 = vshrl.u32 %v172_v9, 7  ;;  %s197_s4 = scalar_lea.sflag [#allocation4], %s618_s24  ;;  %s411_s5 = scalar_lea.vmem %s627_s27, 128 }
  0x3c   : > { %v307_v2 = vrot.slane %v154_v1, 9  ;;  %v308_v3 = vrot.slane %v154_v1, 10  ;;  %v309_v5 = vrot.slane %v154_v1, 11  ;;  %p412_p8 = scmp.ne.s32.totalorder %s627_s27, %s411_s5  ;;  %p689_p9 = scmp.ne.s32.totalorder %s684_s19, 0 }
  0x3d   : > { %v174_v11 = vsub.s32 0, %v173_v10  ;;  %v178_v12 = vsub.s32 4, %v173_v10  ;;  %s496_s9 = smov [#allocation5]  }
  0x3e   : > { %v160_v4 = vadd.f32 %v307_v2, %v154_v1  ;;  %p413_p11 = pnand %p412_p8, %p689_p9  ;;  %s415_s12 = sshll.u32 %s496_s9, 4  ;;  %s416_s12 = int_to_ptr.vmem [resolvable:$false] %s415_s12 }
  0x3f   : > { %s417_s13 = scalar_lea.vmem %s416_s12, 256  ;;  %p418_p7 = scmp.lt.s32.totalorder %s627_s27, %s416_s12 }
  0x40   : > { %v164_v6 = vadd.f32 %v308_v3, %v160_v4  ;;  %p414_p0 = pneg %p413_p11  ;;  %p419_p13 = scmp.lt.s32.totalorder %s417_s13, %s411_s5 }
  0x42   : > { %v168_v7 = vadd.f32 %v309_v5, %v164_v6  ;;  %p420_p3 = por %p419_p13, %p418_p7 }
  0x44   : > { %v169_v8 = vmax.f32 %v168_v7, 1e-24  ;;  %p421_p6 = pnand %p420_p3, %p414_p0 }
  0x46   : > { %379 = vrsqrt.f32 %v169_v8 }
  0x50   : > { %v380_v13 = vpop.eup %379 }
  0x51   : > { %v175_v14 = vrot.slane %v380_v13, %v174_v11  ;;  %v179_v15 = vrot.slane %v380_v13, %v178_v12 }
  0x53   : > { %v185_v16 = vrot.slane %v175_v14, %v174_v11  ;;  %v189_v17 = vrot.slane %v179_v15, %v174_v11 }
  0x55   : > { %v192_v18 = vcombine.low %v185_v16, %v189_v17 }
  0x57   : > { %v194_v19 = vmul.f32 %v192_v18, %v153_v0 }
  0x59   : > { %195 = vst [vmem:[%s150_s18] sm:$0xff] %v194_v19 }
  0x5a   : > { %424 = shalt.err (!%p421_p6)
}
  0x5b   : > { %s425_s15 = scalar_lea.hbm %s632_s3, 128  ;;  %s429_s22 = scalar_lea.hbm %s680_s1, 256 }
  0x5c   : > { %p426_p4 = scmp.ne.s32.totalorder %s632_s3, %s425_s15  ;;  %p430_p1 = scmp.lt.u32.totalorder %s632_s3, %s680_s1 }
  0x5d   : > { %p431_p2 = scmp.lt.u32.totalorder %s429_s22, %s425_s15  ;;  %p433_p8 = scmp.lt.u32.totalorder %s425_s15, %s632_s3 }
  0x5e   : > { %p427_p10 = pnand %p426_p4, %p689_p9 }
  0x5f   : > { %p432_p5 = por %p431_p2, %p430_p1 }
  0x60   : > { %p428_p12 = pneg %p427_p10 }
  0x61   : > { %p434_p11 = por %p433_p8, %p432_p5 }
  0x63   : > { %p435_p0 = pnand %p434_p11, %p428_p12 }
  0x65   : > { %438 = shalt.err (!%p435_p0)
}
  0x66   : > { %319 = dma.vmem_to_hbm [thread:$0]  (%p689_p9), %s627_s27, 128, %s632_s3, %s197_s4  }
  0x67 PF: > { %s225_s25 = sand.u32 1, %s473_s6   ;;  %p690_p7 = scmp.ne.s32.totalorder %s685_s21, 0 }
  0x68   : > { %p691_p13 = scmp.ge.s32.totalorder %s493_s11, 2  ;;  %s226_s26 = scalar_lea.sflag [#allocation4], %s225_s25 }
  0x6a   : > { %p326_p3 = pnand %p691_p13, %p690_p7 }
  0x6c   : > { %468 = dma.done.wait (!%p326_p3), %s226_s26, 128  }
  0x6d   : > { %470 = vsyncadd (!%p326_p3), %s226_s26, 4294967168  ;;  %s17_s11 = sadd.s32 1, %s493_s11   ;;  %s692_s6 = smov %s477_s7 }
  0x6e   : > { %p14_p6 = scmp.ge.s32.totalorder %s17_s11, 4   ;;  %s693_s7 = smov %s481_s8 }
  0x6f   : > { %s694_s8 = smov %s563_s20  ;;  %s695_s9 = smov %s489_s10 }
  0x70   : > { %s696_s10 = smov %s698_s14  ;;  %16 = sbr.rel (!%p14_p6) target bundleno = 6 (0x6), region = 69 }
  0x77   :  { %231 = vsyncpa [#allocation3], 1 }
  0x78   :  { %233 = vsyncpa [#allocation3 + $0x1], 1 }
  0x79   :  { %234 = vsyncpa [#allocation4], 1 }
  0x7a   :  { %236 = vsyncpa [#allocation4 + $0x1], 1 }

</bundles_post_ra>
